<compile_context>
chip_gen: v7x
topology: tpu7x:2x2x1
jax: 0.10.0
libtpu: 0.0.40
codegen_flags: <defaults>
</compile_context>

<pallas_src>
import math
from functools import partial

import jax
import jax.numpy as jnp
from jax.experimental import pallas as pl
from jax.experimental.pallas import tpu as pltpu

FEATURES = 4      # score-net features
EMBED = 16        # time embedding features
HIDDEN = 64       # ResMLP hidden width
TEMB_IN = 32      # cat(cos, sin) of the 16 frequencies
TEMB_HID = 256    # TimeEmbedding hidden width
OUT_PAD = 128     # lane-dense padded output width
PACK_IN = 8       # packed input width: x (4) | t (1) | zero pad (3)

# ---- row offsets inside the (520, 64) weight slab (all multiples of 8) ----
_R_WTEMB = 0                    # W_temb = tw2 @ w_in_t          rows 0:256
_R_WINX = _R_WTEMB + TEMB_HID   # w_in_x padded to 8 rows        rows 256:264
_R_WA1 = _R_WINX + PACK_IN      # rows 264:328
_R_WB1 = _R_WA1 + HIDDEN        # rows 328:392
_R_WA2 = _R_WB1 + HIDDEN        # rows 392:456
_R_WB2 = _R_WA2 + HIDDEN        # rows 456:520
_WSLAB_ROWS = _R_WB2 + HIDDEN   # 520

# ---- row indices inside the (16, 256) f32 vector slab ----
_V_TB1 = 0        # TimeEmbedding first bias            (256 lanes)
_V_BOUT = 1       # output bias padded to 128 lanes
_V_FREQ2 = 2      # [freqs, freqs]                      (32 lanes)
_V_PHASE = 3      # [pi/2 * 16, 0 * 16]                 (32 lanes)
_V_BIN = 4        # folded input-projection bias        (64 lanes)
_V_G1, _V_BE1, _V_BA1, _V_BB1 = 5, 6, 7, 8
_V_G2, _V_BE2, _V_BA2, _V_BB2 = 9, 10, 11, 12
_VECS_ROWS = 16


def _ceil_to(n, m):
    return ((n + m - 1) // m) * m


def _layer_norm(x, gamma, beta, eps=1e-5):
    mu = jnp.mean(x, axis=-1, keepdims=True)
    var = jnp.mean((x - mu) ** 2, axis=-1, keepdims=True)
    return (x - mu) * jax.lax.rsqrt(var + eps) * gamma + beta


def scorenet_kernel(xt_ref, tw1_ref, wslab_ref, w_out_ref, vecs_ref, o_ref):
    f32 = jnp.float32
    wd = wslab_ref.dtype   # MXU-input dtype (f32 or bf16); accumulation always f32

    V = vecs_ref[...]                                   # (16, 256) f32, ~4 vregs
    tb1 = V[_V_TB1:_V_TB1 + 1, :]                       # (1, 256)
    b_out = V[_V_BOUT:_V_BOUT + 1, :OUT_PAD]            # (1, 128)
    freqs2 = V[_V_FREQ2:_V_FREQ2 + 1, :TEMB_IN]         # (1, 32)
    phase = V[_V_PHASE:_V_PHASE + 1, :TEMB_IN]          # (1, 32)
    b_in = V[_V_BIN:_V_BIN + 1, :HIDDEN]                # (1, 64)

    def vec(r):
        return V[r:r + 1, :HIDDEN]                      # (1, 64)

    xt = xt_ref[...]                                    # (tb, 8) f32: x | t | 0
    t = xt[:, FEATURES:FEATURES + 1]                    # (tb, 1)
    x8 = xt.astype(wd)                                  # t / pad columns hit zero weight rows

    # ---- TimeEmbedding first linear (K=32) + folded temb projection ----
    # cat(cos(t*f), sin(t*f)) == sin(t*[f,f] + [pi/2, 0]): one EUP call, no select.
    e = jnp.sin(t * freqs2 + phase).astype(wd)          # (tb, 32)

    # z = x @ W_in_x + silu(e @ tw1 + tb1) @ (tw2 @ W_in_t) + (b_in + tb2 @ W_in_t)
    z = (jnp.dot(x8, wslab_ref[_R_WINX:_R_WINX + PACK_IN, :],
                 preferred_element_type=f32) + b_in)    # (tb, 64) f32
    # chunk the 256-wide hidden (2 x 128, statically unrolled) to bound live vregs
    for c in range(TEMB_HID // 128):
        lo, hi = c * 128, (c + 1) * 128
        h = (jnp.dot(e, tw1_ref[:, lo:hi], preferred_element_type=f32)
             + tb1[:, lo:hi])                           # (tb, 128) f32
        h = (h * jax.nn.sigmoid(h)).astype(wd)          # SiLU
        z = z + jnp.dot(h, wslab_ref[_R_WTEMB + lo:_R_WTEMB + hi, :],
                        preferred_element_type=f32)

    def res_block(z, g, be, wa_row, ba, wb_row, bb):
        y = _layer_norm(z, g, be).astype(wd)
        y = jnp.dot(y, wslab_ref[wa_row:wa_row + HIDDEN, :],
                    preferred_element_type=f32) + ba
        y = jnp.maximum(y, 0.0).astype(wd)
        y = jnp.dot(y, wslab_ref[wb_row:wb_row + HIDDEN, :],
                    preferred_element_type=f32) + bb
        return z + y

    z = res_block(z, vec(_V_G1), vec(_V_BE1), _R_WA1, vec(_V_BA1), _R_WB1, vec(_V_BB1))
    z = res_block(z, vec(_V_G2), vec(_V_BE2), _R_WA2, vec(_V_BA2), _R_WB2, vec(_V_BB2))

    # ---- lane-dense (tb, 128) output (w_out/b_out zero-padded in the wrapper) ----
    o_ref[...] = (jnp.dot(z.astype(wd), w_out_ref[...],
                          preferred_element_type=f32) + b_out).astype(o_ref.dtype)


def pack_params(params, compute_dtype=jnp.float32):
    """Fold + pack the raw parameter dict into 4 kernel operands.

    compute_dtype: MXU-input dtype for the weight slabs (f32 default; bf16 is a
    good choice on v6e/v7x).  Biases / LN params / accumulation stay f32.
    """
    f32 = jnp.float32
    cd = jnp.dtype(compute_dtype)
    p = {k: jnp.asarray(v, f32) for k, v in params.items()}

    # Exact algebraic fold of the second TimeEmbedding linear into the ResMLP
    # input projection (done once, in f32).
    w_temb = p["tw2"] @ p["w_in_t"]                         # (256, 64)
    b_in = p["b_in"] + p["tb2"] @ p["w_in_t"]               # (1, 64)

    w_in_x_pad = jnp.zeros((PACK_IN, HIDDEN), f32).at[:FEATURES, :].set(p["w_in_x"])
    wslab = jnp.concatenate(
        [w_temb, w_in_x_pad, p["wa1"], p["wb1"], p["wa2"], p["wb2"]],
        axis=0).astype(cd)                                  # (520, 64)
    assert wslab.shape == (_WSLAB_ROWS, HIDDEN)

    tw1 = p["tw1"].astype(cd)                               # (32, 256)

    w_out = (jnp.zeros((HIDDEN, OUT_PAD), f32)
             .at[:, :FEATURES].set(p["w_out"]).astype(cd))  # (64, 128) lane-dense

    freqs = p["freqs"].reshape(-1)                          # (16,)
    freqs2 = jnp.concatenate([freqs, freqs])                # (32,)
    phase = jnp.concatenate([jnp.full((EMBED,), jnp.pi / 2, f32),
                             jnp.zeros((EMBED,), f32)])     # cos(x) == sin(x + pi/2)

    def row(v, width):
        return jnp.zeros((1, TEMB_HID), f32).at[0, :width].set(jnp.reshape(v, (-1,)))

    rows = [
        row(p["tb1"], TEMB_HID),
        row(p["b_out"], FEATURES),
        row(freqs2, TEMB_IN),
        row(phase, TEMB_IN),
        row(b_in, HIDDEN),
        row(p["g1"], HIDDEN), row(p["be1"], HIDDEN), row(p["ba1"], HIDDEN), row(p["bb1"], HIDDEN),
        row(p["g2"], HIDDEN), row(p["be2"], HIDDEN), row(p["ba2"], HIDDEN), row(p["bb2"], HIDDEN),
    ]
    vecs = jnp.concatenate(
        rows + [jnp.zeros((_VECS_ROWS - len(rows), TEMB_HID), f32)], axis=0)  # (16, 256)

    return {"tw1": tw1, "wslab": wslab, "w_out": w_out, "vecs": vecs}


@partial(jax.jit, static_argnames=("tb", "num_cores"))
def scorenet_forward(x, t, packed, tb=256, num_cores=1):
    """Fused ScoreNet forward on packed params.

    tb:        max batch tile (multiple of 8); auto-clipped to the batch.
    num_cores: pass 2 on v7x so the (parallel) grid splits evenly across its two
               TensorCores; leave 1 on v5e/v6e (single TC -> single step is best).
    """
    B, F = x.shape
    assert F == FEATURES, f"expected {FEATURES} features, got {F}"
    f32 = jnp.float32

    t = jnp.asarray(t, f32).reshape(-1)
    if t.shape[0] == 1 and B != 1:
        t = jnp.broadcast_to(t, (B,))

    # --- tile / grid policy (static python ints at trace time) ---
    tb_eff = _ceil_to(max(8, min(tb, B)), 8)
    Bp = _ceil_to(B, tb_eff)
    steps = Bp // tb_eff
    if num_cores > 1 and steps > 1 and steps % num_cores != 0:
        steps = _ceil_to(steps, num_cores)      # balanced across TensorCores (v7x)
        Bp = steps * tb_eff

    # --- packed (B, 8) input: x | t | zero pad (t/pad cols hit zero weight rows) ---
    xt = jnp.concatenate(
        [x.astype(f32), t.reshape(B, 1), jnp.zeros((B, PACK_IN - FEATURES - 1), f32)],
        axis=1)
    if Bp != B:
        xt = jnp.pad(xt, ((0, Bp - B), (0, 0)))

    full = lambda a: pl.BlockSpec(a.shape, lambda i: (0, 0))
    in_specs = [
        pl.BlockSpec((tb_eff, PACK_IN), lambda i: (i, 0)),
        full(packed["tw1"]), full(packed["wslab"]),
        full(packed["w_out"]), full(packed["vecs"]),
    ]
    out_spec = pl.BlockSpec((tb_eff, OUT_PAD), lambda i: (i, 0))

    # advisory cost estimate for the XLA scheduler
    flops_row = 2 * (TEMB_IN * TEMB_HID + TEMB_HID * HIDDEN + PACK_IN * HIDDEN
                     + 4 * HIDDEN * HIDDEN + HIDDEN * OUT_PAD)
    param_bytes = sum(int(a.size) * a.dtype.itemsize for a in packed.values())
    cost = pl.CostEstimate(
        flops=flops_row * Bp,
        transcendentals=(TEMB_IN + TEMB_HID + 2) * Bp,   # sin + sigmoid + 2 rsqrt
        bytes_accessed=param_bytes + Bp * 4 * (PACK_IN + OUT_PAD),
    )

    out = pl.pallas_call(
        scorenet_kernel,
        out_shape=jax.ShapeDtypeStruct((Bp, OUT_PAD), f32),
        grid=(steps,),
        in_specs=in_specs,
        out_specs=out_spec,
        compiler_params=pltpu.CompilerParams(dimension_semantics=("parallel",)),
        cost_estimate=cost,
    )(xt, packed["tw1"], packed["wslab"], packed["w_out"], packed["vecs"])

    return out[:B, :FEATURES]


def init_params(key):
    """Deterministic PyTorch-default-style (uniform +/- 1/sqrt(fan_in)) init."""
    def lin(k, fan_in, fan_out):
        bound = 1.0 / math.sqrt(fan_in)
        kw, kb = jax.random.split(k)
        w = jax.random.uniform(kw, (fan_in, fan_out), jnp.float32, -bound, bound)
        b = jax.random.uniform(kb, (1, fan_out), jnp.float32, -bound, bound)
        return w, b

    ks = jax.random.split(key, 8)
    p = {}
    p["freqs"] = (jnp.pi * jnp.arange(1, 17, dtype=jnp.float32)).reshape(1, 16)
    p["tw1"], p["tb1"] = lin(ks[0], TEMB_IN, TEMB_HID)
    p["tw2"], p["tb2"] = lin(ks[1], TEMB_HID, EMBED)
    w_in, p["b_in"] = lin(ks[2], FEATURES + EMBED, HIDDEN)
    p["w_in_x"], p["w_in_t"] = w_in[:FEATURES], w_in[FEATURES:]
    p["g1"] = jnp.ones((1, HIDDEN), jnp.float32)
    p["be1"] = jnp.zeros((1, HIDDEN), jnp.float32)
    p["wa1"], p["ba1"] = lin(ks[3], HIDDEN, HIDDEN)
    p["wb1"], p["bb1"] = lin(ks[4], HIDDEN, HIDDEN)
    p["g2"] = jnp.ones((1, HIDDEN), jnp.float32)
    p["be2"] = jnp.zeros((1, HIDDEN), jnp.float32)
    p["wa2"], p["ba2"] = lin(ks[5], HIDDEN, HIDDEN)
    p["wb2"], p["bb2"] = lin(ks[6], HIDDEN, HIDDEN)
    p["w_out"], p["b_out"] = lin(ks[7], HIDDEN, FEATURES)
    return p


def scorenet_reference(x, t, p):
    """Pure-JAX reference mirroring the PyTorch forward (un-folded)."""
    t = t.reshape(-1, 1)
    tf = t * p["freqs"]
    e = jnp.concatenate([jnp.cos(tf), jnp.sin(tf)], axis=-1)
    h = e @ p["tw1"] + p["tb1"]
    h = h * jax.nn.sigmoid(h)
    temb = h @ p["tw2"] + p["tb2"]
    z = x @ p["w_in_x"] + temb @ p["w_in_t"] + p["b_in"]
    for i in ("1", "2"):
        y = _layer_norm(z, p["g" + i], p["be" + i])
        y = jnp.maximum(y @ p["wa" + i] + p["ba" + i], 0.0)
        y = y @ p["wb" + i] + p["bb" + i]
        z = z + y
    return z @ p["w_out"] + p["b_out"]


if __name__ == "__main__":
    key = jax.random.PRNGKey(0)
    kp, kx, kt = jax.random.split(key, 3)
    params = init_params(kp)
    packed = pack_params(params)                       # f32 MXU path

    # small deterministic test batch
    B = 16
    x = jax.random.normal(kx, (B, FEATURES), jnp.float32)
    t = jax.random.uniform(kt, (B,), jnp.float32)

    out = jax.block_until_ready(scorenet_forward(x, t, packed))
    ref = scorenet_reference(x, t, params)
    assert out.shape == (B, FEATURES)
    assert jnp.allclose(out, ref, atol=5e-4, rtol=5e-4), "f32 mismatch vs reference"

    # batch not a multiple of the tile -> exercises padding + multi-step
    # balanced grid (num_cores=2 rounds 3 steps up to 4, as on v7x)
    B2 = 20
    x2 = jax.random.normal(kx, (B2, FEATURES), jnp.float32)
    t2 = jax.random.uniform(kt, (B2,), jnp.float32)
    out2 = jax.block_until_ready(scorenet_forward(x2, t2, packed, tb=8, num_cores=2))
    ref2 = scorenet_reference(x2, t2, params)
    assert out2.shape == (B2, FEATURES)
    assert jnp.allclose(out2, ref2, atol=5e-4, rtol=5e-4), "padded-batch mismatch"

    # optional bf16 MXU path (v6e/v7x perf option); f32 accumulation, loose tol
    packed_bf16 = pack_params(params, compute_dtype=jnp.bfloat16)
    out_bf = jax.block_until_ready(scorenet_forward(x, t, packed_bf16))
    assert out_bf.shape == (B, FEATURES)
    assert jnp.allclose(out_bf, ref, atol=5e-2, rtol=5e-2), "bf16 mismatch vs reference"

    print("KERNEL_OK")
</pallas_src>

<mosaic_0001>
module attributes {stable_mosaic.version = 11 : i64} {
  func.func @scorenet_kernel(%arg0: i32, %arg1: memref<16x8xf32, #tpu.memory_space<vmem>>, %arg2: memref<32x256xf32, #tpu.memory_space<vmem>>, %arg3: memref<520x64xf32, #tpu.memory_space<vmem>>, %arg4: memref<64x128xf32, #tpu.memory_space<vmem>>, %arg5: memref<16x256xf32, #tpu.memory_space<vmem>>, %arg6: memref<16x128xf32, #tpu.memory_space<vmem>>) attributes {dimension_semantics = [#tpu.dimension_semantics<parallel>], iteration_bounds = array<i64: 1>, scalar_prefetch = 0 : i64, scratch_operands = 0 : i64, tpu.core_type = #tpu.core_type<tc>, window_params = [{transform_indices = @transform_0, window_bounds = array<i64: 16, 8>}, {pipeline_mode = #tpu.pipeline_mode<synchronous>, transform_indices = @transform_1, window_bounds = array<i64: 32, 256>}, {pipeline_mode = #tpu.pipeline_mode<synchronous>, transform_indices = @transform_2, window_bounds = array<i64: 520, 64>}, {pipeline_mode = #tpu.pipeline_mode<synchronous>, transform_indices = @transform_3, window_bounds = array<i64: 64, 128>}, {pipeline_mode = #tpu.pipeline_mode<synchronous>, transform_indices = @transform_4, window_bounds = array<i64: 16, 256>}, {transform_indices = @transform_5, window_bounds = array<i64: 16, 128>}]} {
    %c0 = arith.constant 0 : index
    %c0_0 = arith.constant 0 : index
    %0 = vector.load %arg5[%c0, %c0_0] : memref<16x256xf32, #tpu.memory_space<vmem>>, vector<16x256xf32>
    %1 = vector.extract_strided_slice %0 {offsets = [0, 0], sizes = [1, 256], strides = [1, 1]} : vector<16x256xf32> to vector<1x256xf32>
    %2 = vector.extract_strided_slice %0 {offsets = [1, 0], sizes = [1, 128], strides = [1, 1]} : vector<16x256xf32> to vector<1x128xf32>
    %3 = vector.extract_strided_slice %0 {offsets = [2, 0], sizes = [1, 32], strides = [1, 1]} : vector<16x256xf32> to vector<1x32xf32>
    %4 = vector.extract_strided_slice %0 {offsets = [3, 0], sizes = [1, 32], strides = [1, 1]} : vector<16x256xf32> to vector<1x32xf32>
    %5 = vector.extract_strided_slice %0 {offsets = [4, 0], sizes = [1, 64], strides = [1, 1]} : vector<16x256xf32> to vector<1x64xf32>
    %c0_1 = arith.constant 0 : index
    %c0_2 = arith.constant 0 : index
    %6 = vector.load %arg1[%c0_1, %c0_2] : memref<16x8xf32, #tpu.memory_space<vmem>>, vector<16x8xf32>
    %7 = vector.extract_strided_slice %6 {offsets = [0, 4], sizes = [16, 1], strides = [1, 1]} : vector<16x8xf32> to vector<16x1xf32>
    %8 = vector.broadcast %7 : vector<16x1xf32> to vector<16x32xf32>
    %9 = vector.broadcast %3 : vector<1x32xf32> to vector<16x32xf32>
    %10 = arith.mulf %8, %9 : vector<16x32xf32>
    %11 = vector.broadcast %4 : vector<1x32xf32> to vector<16x32xf32>
    %12 = arith.addf %10, %11 : vector<16x32xf32>
    %13 = math.sin %12 : vector<16x32xf32>
    %c256 = arith.constant 256 : index
    %c0_3 = arith.constant 0 : index
    %14 = vector.load %arg3[%c256, %c0_3] : memref<520x64xf32, #tpu.memory_space<vmem>>, vector<8x64xf32>
    %cst = arith.constant dense<0.000000e+00> : vector<16x64xf32>
    %15 = tpu.matmul %6, %14, %cst {dimension_numbers = #tpu.dot_dimension_numbers<[1], [0], [0], [1], [0, 0, 1, 1], [], []>} : vector<16x8xf32>, vector<8x64xf32>, vector<16x64xf32> -> vector<16x64xf32>
    %16 = vector.broadcast %5 : vector<1x64xf32> to vector<16x64xf32>
    %17 = arith.addf %15, %16 : vector<16x64xf32>
    %c0_4 = arith.constant 0 : index
    %c0_5 = arith.constant 0 : index
    %18 = vector.load %arg2[%c0_4, %c0_5] : memref<32x256xf32, #tpu.memory_space<vmem>>, vector<32x128xf32>
    %cst_6 = arith.constant dense<0.000000e+00> : vector<16x128xf32>
    %19 = tpu.matmul %13, %18, %cst_6 {dimension_numbers = #tpu.dot_dimension_numbers<[1], [0], [0], [1], [0, 0, 1, 1], [], []>} : vector<16x32xf32>, vector<32x128xf32>, vector<16x128xf32> -> vector<16x128xf32>
    %20 = vector.extract_strided_slice %1 {offsets = [0, 0], sizes = [1, 128], strides = [1, 1]} : vector<1x256xf32> to vector<1x128xf32>
    %21 = vector.broadcast %20 : vector<1x128xf32> to vector<16x128xf32>
    %22 = arith.addf %19, %21 : vector<16x128xf32>
    %23 = arith.negf %22 : vector<16x128xf32>
    %24 = math.exp %23 : vector<16x128xf32>
    %cst_7 = arith.constant 1.000000e+00 : f32
    %25 = vector.broadcast %cst_7 : f32 to vector<16x128xf32>
    %26 = arith.addf %25, %24 : vector<16x128xf32>
    %27 = arith.divf %25, %26 : vector<16x128xf32>
    %28 = arith.mulf %22, %27 : vector<16x128xf32>
    %c0_8 = arith.constant 0 : index
    %c0_9 = arith.constant 0 : index
    %29 = vector.load %arg3[%c0_8, %c0_9] : memref<520x64xf32, #tpu.memory_space<vmem>>, vector<128x64xf32>
    %cst_10 = arith.constant dense<0.000000e+00> : vector<16x64xf32>
    %30 = tpu.matmul %28, %29, %cst_10 {dimension_numbers = #tpu.dot_dimension_numbers<[1], [0], [0], [1], [0, 0, 1, 1], [], []>} : vector<16x128xf32>, vector<128x64xf32>, vector<16x64xf32> -> vector<16x64xf32>
    %31 = arith.addf %17, %30 : vector<16x64xf32>
    %c0_11 = arith.constant 0 : index
    %c128 = arith.constant 128 : index
    %32 = vector.load %arg2[%c0_11, %c128] : memref<32x256xf32, #tpu.memory_space<vmem>>, vector<32x128xf32>
    %cst_12 = arith.constant dense<0.000000e+00> : vector<16x128xf32>
    %33 = tpu.matmul %13, %32, %cst_12 {dimension_numbers = #tpu.dot_dimension_numbers<[1], [0], [0], [1], [0, 0, 1, 1], [], []>} : vector<16x32xf32>, vector<32x128xf32>, vector<16x128xf32> -> vector<16x128xf32>
    %34 = vector.extract_strided_slice %1 {offsets = [0, 128], sizes = [1, 128], strides = [1, 1]} : vector<1x256xf32> to vector<1x128xf32>
    %35 = vector.broadcast %34 : vector<1x128xf32> to vector<16x128xf32>
    %36 = arith.addf %33, %35 : vector<16x128xf32>
    %37 = arith.negf %36 : vector<16x128xf32>
    %38 = math.exp %37 : vector<16x128xf32>
    %cst_13 = arith.constant 1.000000e+00 : f32
    %39 = vector.broadcast %cst_13 : f32 to vector<16x128xf32>
    %40 = arith.addf %39, %38 : vector<16x128xf32>
    %41 = arith.divf %39, %40 : vector<16x128xf32>
    %42 = arith.mulf %36, %41 : vector<16x128xf32>
    %c128_14 = arith.constant 128 : index
    %c0_15 = arith.constant 0 : index
    %43 = vector.load %arg3[%c128_14, %c0_15] : memref<520x64xf32, #tpu.memory_space<vmem>>, vector<128x64xf32>
    %cst_16 = arith.constant dense<0.000000e+00> : vector<16x64xf32>
    %44 = tpu.matmul %42, %43, %cst_16 {dimension_numbers = #tpu.dot_dimension_numbers<[1], [0], [0], [1], [0, 0, 1, 1], [], []>} : vector<16x128xf32>, vector<128x64xf32>, vector<16x64xf32> -> vector<16x64xf32>
    %45 = arith.addf %31, %44 : vector<16x64xf32>
    %46 = vector.extract_strided_slice %0 {offsets = [5, 0], sizes = [1, 64], strides = [1, 1]} : vector<16x256xf32> to vector<1x64xf32>
    %47 = vector.extract_strided_slice %0 {offsets = [6, 0], sizes = [1, 64], strides = [1, 1]} : vector<16x256xf32> to vector<1x64xf32>
    %48 = vector.extract_strided_slice %0 {offsets = [7, 0], sizes = [1, 64], strides = [1, 1]} : vector<16x256xf32> to vector<1x64xf32>
    %49 = vector.extract_strided_slice %0 {offsets = [8, 0], sizes = [1, 64], strides = [1, 1]} : vector<16x256xf32> to vector<1x64xf32>
    %cst_17 = arith.constant dense<0.000000e+00> : vector<16xf32>
    %50 = vector.multi_reduction <add>, %45, %cst_17 [1] : vector<16x64xf32> to vector<16xf32>
    %51 = vector.shape_cast %50 : vector<16xf32> to vector<16x1xf32>
    %cst_18 = arith.constant 6.400000e+01 : f32
    %52 = vector.broadcast %cst_18 : f32 to vector<16x1xf32>
    %53 = arith.divf %51, %52 : vector<16x1xf32>
    %54 = vector.broadcast %53 : vector<16x1xf32> to vector<16x64xf32>
    %55 = arith.subf %45, %54 : vector<16x64xf32>
    %56 = arith.mulf %55, %55 : vector<16x64xf32>
    %cst_19 = arith.constant dense<0.000000e+00> : vector<16xf32>
    %57 = vector.multi_reduction <add>, %56, %cst_19 [1] : vector<16x64xf32> to vector<16xf32>
    %58 = vector.shape_cast %57 : vector<16xf32> to vector<16x1xf32>
    %cst_20 = arith.constant 6.400000e+01 : f32
    %59 = vector.broadcast %cst_20 : f32 to vector<16x1xf32>
    %60 = arith.divf %58, %59 : vector<16x1xf32>
    %61 = vector.broadcast %53 : vector<16x1xf32> to vector<16x64xf32>
    %62 = arith.subf %45, %61 : vector<16x64xf32>
    %cst_21 = arith.constant 9.99999974E-6 : f32
    %63 = vector.broadcast %cst_21 : f32 to vector<16x1xf32>
    %64 = arith.addf %60, %63 : vector<16x1xf32>
    %65 = math.rsqrt %64 : vector<16x1xf32>
    %66 = vector.broadcast %65 : vector<16x1xf32> to vector<16x64xf32>
    %67 = arith.mulf %62, %66 : vector<16x64xf32>
    %68 = vector.broadcast %46 : vector<1x64xf32> to vector<16x64xf32>
    %69 = arith.mulf %67, %68 : vector<16x64xf32>
    %70 = vector.broadcast %47 : vector<1x64xf32> to vector<16x64xf32>
    %71 = arith.addf %69, %70 : vector<16x64xf32>
    %c264 = arith.constant 264 : index
    %c0_22 = arith.constant 0 : index
    %72 = vector.load %arg3[%c264, %c0_22] : memref<520x64xf32, #tpu.memory_space<vmem>>, vector<64x64xf32>
    %cst_23 = arith.constant dense<0.000000e+00> : vector<16x64xf32>
    %73 = tpu.matmul %71, %72, %cst_23 {dimension_numbers = #tpu.dot_dimension_numbers<[1], [0], [0], [1], [0, 0, 1, 1], [], []>} : vector<16x64xf32>, vector<64x64xf32>, vector<16x64xf32> -> vector<16x64xf32>
    %74 = vector.broadcast %48 : vector<1x64xf32> to vector<16x64xf32>
    %75 = arith.addf %73, %74 : vector<16x64xf32>
    %cst_24 = arith.constant 0.000000e+00 : f32
    %76 = vector.broadcast %cst_24 : f32 to vector<16x64xf32>
    %77 = arith.maximumf %75, %76 : vector<16x64xf32>
    %c328 = arith.constant 328 : index
    %c0_25 = arith.constant 0 : index
    %78 = vector.load %arg3[%c328, %c0_25] : memref<520x64xf32, #tpu.memory_space<vmem>>, vector<64x64xf32>
    %cst_26 = arith.constant dense<0.000000e+00> : vector<16x64xf32>
    %79 = tpu.matmul %77, %78, %cst_26 {dimension_numbers = #tpu.dot_dimension_numbers<[1], [0], [0], [1], [0, 0, 1, 1], [], []>} : vector<16x64xf32>, vector<64x64xf32>, vector<16x64xf32> -> vector<16x64xf32>
    %80 = vector.broadcast %49 : vector<1x64xf32> to vector<16x64xf32>
    %81 = arith.addf %79, %80 : vector<16x64xf32>
    %82 = arith.addf %45, %81 : vector<16x64xf32>
    %83 = vector.extract_strided_slice %0 {offsets = [9, 0], sizes = [1, 64], strides = [1, 1]} : vector<16x256xf32> to vector<1x64xf32>
    %84 = vector.extract_strided_slice %0 {offsets = [10, 0], sizes = [1, 64], strides = [1, 1]} : vector<16x256xf32> to vector<1x64xf32>
    %85 = vector.extract_strided_slice %0 {offsets = [11, 0], sizes = [1, 64], strides = [1, 1]} : vector<16x256xf32> to vector<1x64xf32>
    %86 = vector.extract_strided_slice %0 {offsets = [12, 0], sizes = [1, 64], strides = [1, 1]} : vector<16x256xf32> to vector<1x64xf32>
    %cst_27 = arith.constant dense<0.000000e+00> : vector<16xf32>
    %87 = vector.multi_reduction <add>, %82, %cst_27 [1] : vector<16x64xf32> to vector<16xf32>
    %88 = vector.shape_cast %87 : vector<16xf32> to vector<16x1xf32>
    %cst_28 = arith.constant 6.400000e+01 : f32
    %89 = vector.broadcast %cst_28 : f32 to vector<16x1xf32>
    %90 = arith.divf %88, %89 : vector<16x1xf32>
    %91 = vector.broadcast %90 : vector<16x1xf32> to vector<16x64xf32>
    %92 = arith.subf %82, %91 : vector<16x64xf32>
    %93 = arith.mulf %92, %92 : vector<16x64xf32>
    %cst_29 = arith.constant dense<0.000000e+00> : vector<16xf32>
    %94 = vector.multi_reduction <add>, %93, %cst_29 [1] : vector<16x64xf32> to vector<16xf32>
    %95 = vector.shape_cast %94 : vector<16xf32> to vector<16x1xf32>
    %cst_30 = arith.constant 6.400000e+01 : f32
    %96 = vector.broadcast %cst_30 : f32 to vector<16x1xf32>
    %97 = arith.divf %95, %96 : vector<16x1xf32>
    %98 = vector.broadcast %90 : vector<16x1xf32> to vector<16x64xf32>
    %99 = arith.subf %82, %98 : vector<16x64xf32>
    %cst_31 = arith.constant 9.99999974E-6 : f32
    %100 = vector.broadcast %cst_31 : f32 to vector<16x1xf32>
    %101 = arith.addf %97, %100 : vector<16x1xf32>
    %102 = math.rsqrt %101 : vector<16x1xf32>
    %103 = vector.broadcast %102 : vector<16x1xf32> to vector<16x64xf32>
    %104 = arith.mulf %99, %103 : vector<16x64xf32>
    %105 = vector.broadcast %83 : vector<1x64xf32> to vector<16x64xf32>
    %106 = arith.mulf %104, %105 : vector<16x64xf32>
    %107 = vector.broadcast %84 : vector<1x64xf32> to vector<16x64xf32>
    %108 = arith.addf %106, %107 : vector<16x64xf32>
    %c392 = arith.constant 392 : index
    %c0_32 = arith.constant 0 : index
    %109 = vector.load %arg3[%c392, %c0_32] : memref<520x64xf32, #tpu.memory_space<vmem>>, vector<64x64xf32>
    %cst_33 = arith.constant dense<0.000000e+00> : vector<16x64xf32>
    %110 = tpu.matmul %108, %109, %cst_33 {dimension_numbers = #tpu.dot_dimension_numbers<[1], [0], [0], [1], [0, 0, 1, 1], [], []>} : vector<16x64xf32>, vector<64x64xf32>, vector<16x64xf32> -> vector<16x64xf32>
    %111 = vector.broadcast %85 : vector<1x64xf32> to vector<16x64xf32>
    %112 = arith.addf %110, %111 : vector<16x64xf32>
    %cst_34 = arith.constant 0.000000e+00 : f32
    %113 = vector.broadcast %cst_34 : f32 to vector<16x64xf32>
    %114 = arith.maximumf %112, %113 : vector<16x64xf32>
    %c456 = arith.constant 456 : index
    %c0_35 = arith.constant 0 : index
    %115 = vector.load %arg3[%c456, %c0_35] : memref<520x64xf32, #tpu.memory_space<vmem>>, vector<64x64xf32>
    %cst_36 = arith.constant dense<0.000000e+00> : vector<16x64xf32>
    %116 = tpu.matmul %114, %115, %cst_36 {dimension_numbers = #tpu.dot_dimension_numbers<[1], [0], [0], [1], [0, 0, 1, 1], [], []>} : vector<16x64xf32>, vector<64x64xf32>, vector<16x64xf32> -> vector<16x64xf32>
    %117 = vector.broadcast %86 : vector<1x64xf32> to vector<16x64xf32>
    %118 = arith.addf %116, %117 : vector<16x64xf32>
    %119 = arith.addf %82, %118 : vector<16x64xf32>
    %c0_37 = arith.constant 0 : index
    %c0_38 = arith.constant 0 : index
    %120 = vector.load %arg4[%c0_37, %c0_38] : memref<64x128xf32, #tpu.memory_space<vmem>>, vector<64x128xf32>
    %cst_39 = arith.constant dense<0.000000e+00> : vector<16x128xf32>
    %121 = tpu.matmul %119, %120, %cst_39 {dimension_numbers = #tpu.dot_dimension_numbers<[1], [0], [0], [1], [0, 0, 1, 1], [], []>} : vector<16x64xf32>, vector<64x128xf32>, vector<16x128xf32> -> vector<16x128xf32>
    %122 = vector.broadcast %2 : vector<1x128xf32> to vector<16x128xf32>
    %123 = arith.addf %121, %122 : vector<16x128xf32>
    %c0_40 = arith.constant 0 : index
    %c0_41 = arith.constant 0 : index
    %124 = vector.load %arg6[%c0_40, %c0_41] : memref<16x128xf32, #tpu.memory_space<vmem>>, vector<16x128xf32>
    tpu.vector_store %arg6[%c0_40, %c0_41], %123 {strides = array<i32>} : memref<16x128xf32, #tpu.memory_space<vmem>>, vector<16x128xf32>,
    return
  }
  func.func @transform_0(%arg0: i32) -> (i32, i32) {
    %c0_i32 = arith.constant 0 : i32
    %c0_i32_0 = arith.constant 0 : i32
    return %arg0, %c0_i32 : i32, i32
  }
  func.func @transform_1(%arg0: i32) -> (i32, i32) {
    %c0_i32 = arith.constant 0 : i32
    %c0_i32_0 = arith.constant 0 : i32
    %c0_i32_1 = arith.constant 0 : i32
    return %c0_i32, %c0_i32_0 : i32, i32
  }
  func.func @transform_2(%arg0: i32) -> (i32, i32) {
    %c0_i32 = arith.constant 0 : i32
    %c0_i32_0 = arith.constant 0 : i32
    %c0_i32_1 = arith.constant 0 : i32
    return %c0_i32, %c0_i32_0 : i32, i32
  }
  func.func @transform_3(%arg0: i32) -> (i32, i32) {
    %c0_i32 = arith.constant 0 : i32
    %c0_i32_0 = arith.constant 0 : i32
    %c0_i32_1 = arith.constant 0 : i32
    return %c0_i32, %c0_i32_0 : i32, i32
  }
  func.func @transform_4(%arg0: i32) -> (i32, i32) {
    %c0_i32 = arith.constant 0 : i32
    %c0_i32_0 = arith.constant 0 : i32
    %c0_i32_1 = arith.constant 0 : i32
    return %c0_i32, %c0_i32_0 : i32, i32
  }
  func.func @transform_5(%arg0: i32) -> (i32, i32) {
    %c0_i32 = arith.constant 0 : i32
    %c0_i32_0 = arith.constant 0 : i32
    return %arg0, %c0_i32 : i32, i32
  }
}

</mosaic_0001>

<bundles_post_ra>
// kernel: scorenet_forward.1
= control target key start
LH: loop header
LB: loop body
LE: loop exit
PB: predicated region body
PF: predicated region fallthrough
CT: control target
= control target key end

     0   :  { %v1820_v0 = vmov 4   ;;  %vm260_vm0 = vcmask 64512   ;;  %v35_v13 = vlaneseq  ;;  %v1821_v44 = vmov 683565275   ;;  %s2284_s0 = inlined_call_operand.vmem [shape: f32[16,8], index: 0, kind: input, shape index: {}]   ;;  %s2285_s1 = inlined_call_operand.vmem [shape: f32[32,256], index: 1, kind: input, shape index: {}]   ;;  %s2286_s2 = inlined_call_operand.vmem [shape: f32[520,64], index: 2, kind: input, shape index: {}]   ;;  %s2287_s4 = inlined_call_operand.vmem [shape: f32[16,256], index: 4, kind: input, shape index: {}]   ;;  %s2288_s3 = inlined_call_operand.vmem [shape: f32[64,128], index: 3, kind: input, shape index: {}]   ;;  %s2289_s5 = inlined_call_operand.vmem [shape: f32[16,128], index: 5, kind: output, shape index: {}]  }
   0x1   :  { %1786 = vset.pattern.permute.xlu0 %v1820_v0  ;;  %v23_v1 = vld [vmem:[%s2284_s0] sm:$0xff]  ;;  %v24_v2 = vld [vmem:[%s2284_s0 + $0x8] sm:$0xff]  ;;  %v341_v4 = vld [vmem:[%s2285_s1 + $0x10] sm:$0xff]  ;;  %v1822_v47 = vmov 2475754826  }
   0x2   :  { %27 = vperm.xlu0 %1786, %v23_v1   ;;  %v340_v3 = vld [vmem:[%s2285_s1] sm:$0xff]  ;;  %v343_v7 = vld [vmem:[%s2285_s1 + $0x30] sm:$0xff]  ;;  %v537_v9 = vld [vmem:[%s2285_s1 + $0x8] sm:$0xff]  ;;  %1415 = vmatprep.mubr.msk.f32.mxu0 %vm260_vm0, %v23_v1  ;;  %v1887_v14 = vshrl.u32 %v35_v13, 7  ;;  %v1823_v49 = vmov 2131351028  }
   0x3   :  { %v342_v5 = vld [vmem:[%s2285_s1 + $0x20] sm:$0xff]  ;;  %v1605_v6 = vpack.c.bf16 %v341_v4, %v340_v3  ;;  %v538_v10 = vld [vmem:[%s2285_s1 + $0x18] sm:$0xff]  ;;  %v1824_v51 = vmov 2102212464   ;;  %v1825_v56 = vmov 920167782  }
   0x4   :  { %v1609_v8 = vpack.c.bf16 %v343_v7, %v342_v5  ;;  %v1881_v11 = vpack.c.bf16 %v538_v10, %v537_v9  ;;  %v255_v12 = vld [vmem:[%s2286_s2 + $0x100] sm:$0xff]  ;;  %v37_v15 = vsub.s32 2, %v1887_v14  ;;  %v43_v17 = vsub.s32 3, %v1887_v14 }
   0x5   :  { %1606 = vmatprep.subr.bf16.mxu1 %v1605_v6  ;;  %1413 = vmatprep.subr.mxu0 %v255_v12  ;;  %v1893_v16 = vld [vmem:[%s2287_s4] sm:$0xff]  ;;  %v1826_v61 = vmov 1326507024  }
   0x6   :  { %32 = vperm.xlu0 %1786, %v24_v2   ;;  %1608 = vmatpush3.bf16.msra.mxu1 %v1605_v6  ;;  %v38_v18 = vrot.slane %v1893_v16, %v37_v15  ;;  %v44_v19 = vrot.slane %v1893_v16, %v43_v17 }
   0x7   :  { %1610 = vmatprep.subr.bf16.mxu1 %v1609_v8  ;;  %1414 = vmatpush3.msra.mxu0 %v255_v12 }
   0x8   :  { %1416 = vmatmul.mubr.msk.f32.vlgmr.msra.gmra.mrb[0].mxu0 %vm260_vm0, %v24_v2 }
   0xa   :  { %1612 = vmatpush3.bf16.msra.mxu1 %v1609_v8 }
   0xb   :  { %1646 = vmatprep.subr.bf16.mxu1 %v1881_v11 }
  0x81   :  { %v28_v20 = vpop.permute.xlu0 %27 }
  0x82   :  { %v39_v21 = vmul.f32 %v38_v18, %v28_v20 }
  0x84   :  { %v1902_v22 = vadd.f32 %v44_v19, %v39_v21 }
  0x85   :  { %v33_v23 = vpop.permute.xlu0 %32 }
  0x86   :  { %v50_v24 = vand.u32 2139095040, %v1902_v22  ;;  %v40_v25 = vmul.f32 %v38_v18, %v33_v23  ;;  %v47_v28 = vand.u32 2147483647, %v1902_v22  ;;  %vm49_vm15 = vcmp.lt.s32.totalorder %v1902_v22, 0 }
  0x88   :  { %v51_v26 = vshrl.u32 %v50_v24, 23  ;;  %v1905_v27 = vadd.f32 %v44_v19, %v40_v25  ;;  %v54_v34 = vand.u32 8388607, %v47_v28  ;;  %vm48_vm0 = vcmp.le.f32.partialorder %v47_v28, 0.7853982 }
  0x8a   :  { %v1284_v29 = vadd.s32 4294967169, %v51_v26  ;;  %v154_v30 = vand.u32 2139095040, %v1905_v27  ;;  %v151_v31 = vand.u32 2147483647, %v1905_v27  ;;  %v55_v40 = vor.u32 8388608, %v54_v34 }
  0x8c   :  { %v57_v32 = vadd.s32 1, %v1284_v29  ;;  %v155_v33 = vshrl.u32 %v154_v30, 23  ;;  %v158_v35 = vand.u32 8388607, %v151_v31  ;;  %v95_v12 = vshll.u32 %v55_v40, 8 }
  0x8e   :  { %vm58_vm1 = vcmp.gt.s32.totalorder %v57_v32, 0  ;;  %v1288_v36 = vadd.s32 4294967169, %v155_v33  ;;  %v159_v41 = vor.u32 8388608, %v158_v35 }
  0x8f   :  { %v59_v37 = vsel %vm58_vm1, %v57_v32, 0  ;;  %vm153_vm1 = vcmp.lt.s32.totalorder %v1905_v27, 0 }
  0x90   :  { %v61_v38 = vand.u32 31, %v59_v37  ;;  %v161_v39 = vadd.s32 1, %v1288_v36  ;;  %v60_v42 = vshrl.u32 %v59_v37, 5  ;;  %v199_v29 = vshll.u32 %v159_v41, 8 }
  0x92   :  { %v62_v43 = vsub.s32 32, %v61_v38  ;;  %vm162_vm2 = vcmp.gt.s32.totalorder %v161_v39, 0  ;;  %v64_v45 = vshll.u32 %v1821_v44, %v61_v38  ;;  %v67_v48 = vshll.u32 %v1822_v47, %v61_v38 }
  0x93   :  { %v163_v46 = vsel %vm162_vm2, %v161_v39, 0  ;;  %v70_v50 = vshll.u32 %v1823_v49, %v61_v38  ;;  %v73_v52 = vshll.u32 %v1824_v51, %v61_v38  ;;  %v76_v57 = vshll.u32 %v1825_v56, %v61_v38 }
  0x94   :  { %v1915_v53 = vshrl.u32 %v163_v46, 5  ;;  %v165_v54 = vand.u32 31, %v163_v46  ;;  %v65_v55 = vshrl.u32 %v1822_v47, %v62_v43  ;;  %v68_v58 = vshrl.u32 %v1823_v49, %v62_v43 }
  0x95   :  { %v71_v59 = vshrl.u32 %v1824_v51, %v62_v43  ;;  %v74_v60 = vshrl.u32 %v1825_v56, %v62_v43  ;;  %v77_v62 = vshrl.u32 %v1826_v61, %v62_v43  ;;  %v63_v2 = vshrl.u32 %v1821_v44, %v62_v43 }
  0x96   :  { %v166_v63 = vsub.s32 32, %v165_v54  ;;  %v177_v0 = vshll.u32 %v1824_v51, %v165_v54  ;;  %v180_v1 = vshll.u32 %v1825_v56, %v165_v54  ;;  %v66_v3 = vor.u32 %v65_v55, %v64_v45 }
  0x97   :  { %v69_v4 = vor.u32 %v68_v58, %v67_v48  ;;  %v72_v5 = vor.u32 %v71_v59, %v70_v50  ;;  %v75_v6 = vor.u32 %v74_v60, %v73_v52  ;;  %v78_v9 = vor.u32 %v77_v62, %v76_v57 }
  0x98   :  { %v178_v7 = vshrl.u32 %v1825_v56, %v166_v63  ;;  %v181_v8 = vshrl.u32 %v1826_v61, %v166_v63  ;;  %vm79_vm3 = vcmp.lt.s32.totalorder %v60_v42, 1  ;;  %vm81_vm4 = vcmp.lt.s32.totalorder %v60_v42, 3 }
  0x99   :  { %vm82_vm5 = vcmp.lt.s32.totalorder %v60_v42, 4  ;;  %v83_v10 = vsel %vm79_vm3, %v63_v2, %v66_v3  ;;  %v87_v20 = vsel %vm79_vm3, %v66_v3, %v69_v4  ;;  %v91_v24 = vsel %vm79_vm3, %v69_v4, %v72_v5 }
  0x9a   :  { %v179_v13 = vor.u32 %v178_v7, %v177_v0  ;;  %v182_v18 = vor.u32 %v181_v8, %v180_v1  ;;  %v84_v19 = vsel %vm82_vm5, %v72_v5, 2102212464  ;;  %v88_v23 = vsel %vm82_vm5, %v75_v6, 920167782 }
  0x9b   :  { %v85_v21 = vsel %vm81_vm4, %v69_v4, %v84_v19  ;;  %v92_v25 = vsel %vm82_vm5, %v78_v9, 1326507024  ;;  %vm186_vm6 = vcmp.lt.s32.totalorder %v1915_v53, 4  ;;  %vm80_vm7 = vcmp.lt.s32.totalorder %v60_v42, 2 }
  0x9c   :  { %v89_v26 = vsel %vm81_vm4, %v72_v5, %v88_v23  ;;  %v192_v30 = vsel %vm186_vm6, %v179_v13, 920167782  ;;  %v196_v32 = vsel %vm186_vm6, %v182_v18, 1326507024  ;;  %v93_v34 = vsel %vm81_vm4, %v75_v6, %v92_v25 }
  0x9d   :  { %v90_v33 = vsel %vm80_vm7, %v87_v20, %v89_v26  ;;  %v86_v35 = vsel %vm80_vm7, %v83_v10, %v85_v21  ;;  %v94_v36 = vsel %vm80_vm7, %v91_v24, %v93_v34  ;;  %v168_v43 = vshll.u32 %v1821_v44, %v165_v54 }
  0x9e   :  { %v1926_v37 = vmul.u32.u64.low %v95_v12, %v90_v33  ;;  %v1927_v38 = vmul.u32.u64.high %v95_v12, %v90_v33, %v1926_v37  ;;  %v1929_v39 = vmul.u32.u64.low %v95_v12, %v94_v36  ;;  %v1930_v40 = vmul.u32.u64.high %v95_v12, %v94_v36, %v1929_v39 }
  0x9f   :  { %v169_v41 = vshrl.u32 %v1822_v47, %v166_v63  ;;  %v171_v45 = vshll.u32 %v1822_v47, %v165_v54  ;;  %v172_v46 = vshrl.u32 %v1823_v49, %v166_v63  ;;  %v174_v48 = vshll.u32 %v1823_v49, %v165_v54 }
  0xa0   :  { %v175_v50 = vshrl.u32 %v1824_v51, %v166_v63  ;;  %v102_v52 = vmul.u32 %v95_v12, %v86_v35  ;;  %v167_v55 = vshrl.u32 %v1821_v44, %v166_v63  ;;  %vm183_vm8 = vcmp.lt.s32.totalorder %v1915_v53, 1 }
  0xa1   :  { %v170_v42 = vor.u32 %v169_v41, %v168_v43  ;;  %v105_v56 = vadd.s32 1, %v1927_v38  ;;  %v173_v57 = vor.u32 %v172_v46, %v171_v45  ;;  %vm185_vm9 = vcmp.lt.s32.totalorder %v1915_v53, 3 }
  0xa2   :  { %v176_v58 = vor.u32 %v175_v50, %v174_v48  ;;  %vm104_vm10 = vc.u32 %v1930_v40, %v1926_v37  ;;  %vm184_vm11 = vcmp.lt.s32.totalorder %v1915_v53, 2  ;;  %v197_v49 = vsel %vm185_vm9, %v179_v13, %v196_v32 }
  0xa3   :  { %v187_v47 = vsel %vm183_vm8, %v167_v55, %v170_v42  ;;  %v106_v51 = vsel %vm104_vm10, %v105_v56, %v1927_v38  ;;  %v191_v54 = vsel %vm183_vm8, %v170_v42, %v173_v57  ;;  %v103_v33 = vadd.s32 %v1926_v37, %v1930_v40 }
  0xa4   :  { %v188_v44 = vsel %vm186_vm6, %v176_v58, 2102212464  ;;  %v193_v59 = vsel %vm185_vm9, %v176_v58, %v192_v30  ;;  %v107_v60 = vadd.s32 %v106_v51, %v102_v52  ;;  %v195_v63 = vsel %vm183_vm8, %v173_v57, %v176_v58 }
  0xa5   :  { %v189_v61 = vsel %vm185_vm9, %v173_v57, %v188_v44  ;;  %v194_v62 = vsel %vm184_vm11, %v191_v54, %v193_v59  ;;  %v198_v0 = vsel %vm184_vm11, %v195_v63, %v197_v49  ;;  %vm152_vm2 = vcmp.le.f32.partialorder %v151_v31, 0.7853982 }
  0xa6   :  { %v1948_v1 = vmul.u32.u64.low %v199_v29, %v194_v62  ;;  %v1949_v2 = vmul.u32.u64.high %v199_v29, %v194_v62, %v1948_v1  ;;  %v108_v3 = vadd.s32 536870912, %v107_v60  ;;  %v190_v6 = vsel %vm184_vm11, %v187_v47, %v189_v61 }
  0xa7   :  { %v1951_v4 = vmul.u32.u64.low %v199_v29, %v198_v0  ;;  %v1952_v5 = vmul.u32.u64.high %v199_v29, %v198_v0, %v1951_v4  ;;  %v206_v10 = vmul.u32 %v199_v29, %v190_v6  ;;  %vm348_vm6 = vcmask 261120  }
  0xa8   :  { %v109_v7 = vshrl.u32 %v108_v3, 30  ;;  %v209_v8 = vadd.s32 1, %v1949_v2  ;;  %vm139_vm7 = vweird.f32 %v1902_v22  ;;  %vm243_vm11 = vweird.f32 %v1905_v27 }
  0xa9   :  { %vm208_vm12 = vc.u32 %v1952_v5, %v1948_v1  ;;  %v207_v42 = vadd.s32 %v1948_v1, %v1952_v5 }
  0xaa   :  { %v110_v9 = vshll.u32 %v109_v7, 30  ;;  %v210_v12 = vsel %vm208_vm12, %v209_v8, %v1949_v2  ;;  %v133_v40 = vsub.s32 4, %v109_v7  ;;  %vm727_vm12 = vcmask 523264  }
  0xab   :  { %v211_v13 = vadd.s32 %v210_v12, %v206_v10 }
  0xac   :  { %v111_v53 = vsub.s32 %v107_v60, %v110_v9  ;;  %v134_v60 = vsel %vm49_vm15, %v133_v40, %v109_v7  ;;  %v455_v40 = vld [vmem:[%s2286_s2 + $0x58] sm:$0xff] }
  0xad   :  { %v212_v19 = vadd.s32 536870912, %v211_v13  ;;  %v136_v63 = vsel %vm48_vm0, 0, %v134_v60  ;;  %v634_v60 = vld [vmem:[%s2286_s2 + $0x80] sm:$0xff] }
  0xae   :  { %v113_v18 = vsub.s32 0, %v111_v53  ;;  %v140_v4 = vadd.s32 3, %v136_v63  ;;  %v2035_v63 = vsub.s32 0, %v1887_v14 }
  0xaf   :  { %v213_v21 = vshrl.u32 %v212_v19, 30 }
  0xb0   :  { %v1285_v20 = vmin.u32 %v113_v18, %v111_v53  ;;  %v141_v7 = vand.u32 3, %v140_v4 }
  0xb1   :  { %v214_v24 = vshll.u32 %v213_v21, 30  ;;  %v237_v3 = vsub.s32 4, %v213_v21 }
  0xb2   :  { %v115_v23 = vclz %v1285_v20  ;;  %vm146_vm3 = vcmp.eq.s32.totalorder %v141_v7, 2  ;;  %vm143_vm4 = vcmp.eq.s32.totalorder %v141_v7, 0  ;;  %vm142_vm5 = vcmp.lt.s32.totalorder %v141_v7, 2 }
  0xb3   :  { %v215_v26 = vsub.s32 %v211_v13, %v214_v24  ;;  %v238_v6 = vsel %vm153_vm1, %v237_v3, %v213_v21 }
  0xb4   :  { %v1286_v25 = vadd.s32 4294967294, %v115_v23  ;;  %v240_v10 = vsel %vm152_vm2, 0, %v238_v6 }
  0xb5   :  { %v217_v32 = vsub.s32 0, %v215_v26  ;;  %v244_v19 = vadd.s32 3, %v240_v10 }
  0xb6   :  { %vm1287_vm13 = vcmp.lt.s32.totalorder %v1286_v25, 0 }
  0xb7   :  { %v118_v30 = vsel %vm1287_vm13, 0, %v1286_v25  ;;  %v1289_v35 = vmin.u32 %v217_v32, %v215_v26  ;;  %v245_v23 = vand.u32 3, %v244_v19  ;;  %v539_v32 = vld [vmem:[%s2285_s1 + $0x28] sm:$0xff] }
  0xb8   :  { %v119_v29 = vsub.s32 32, %v118_v30  ;;  %v123_v34 = vsub.s32 4294967266, %v118_v30  ;;  %v120_v36 = vshll.u32 %v111_v53, %v118_v30 }
  0xb9   :  { %v219_v43 = vclz %v1289_v35  ;;  %vm250_vm8 = vcmp.eq.s32.totalorder %v245_v23, 2  ;;  %vm247_vm9 = vcmp.eq.s32.totalorder %v245_v23, 0  ;;  %vm246_vm10 = vcmp.lt.s32.totalorder %v245_v23, 2 }
  0xba   :  { %v121_v38 = vshrl.u32 %v103_v33, %v119_v29  ;;  %v124_v39 = vadd.s32 127, %v123_v34  ;;  %v540_v33 = vld [vmem:[%s2285_s1 + $0x38] sm:$0xff] }
  0xbb   :  { %v1290_v46 = vadd.s32 4294967294, %v219_v43  ;;  %v1649_v35 = vpack.c.bf16 %v540_v33, %v539_v32  ;;  %v447_v43 = vld [vmem:[%s2286_s2 + $0x18] sm:$0xff] }
  0xbc   :  { %v122_v41 = vor.u32 %v121_v38, %v120_v36  ;;  %v125_v45 = vshll.u32 %v124_v39, 23  ;;  %v444_v38 = vld [vmem:[%s2286_s2] sm:$0xff] }
  0xbd   :  { %vm1291_vm14 = vcmp.lt.s32.totalorder %v1290_v46, 0 }
  0xbe   :  { %v126_v48 = vor.u32 4788187, %v125_v45  ;;  %v129_v52 = vcvt.s32.f32 %v122_v41  ;;  %v222_v55 = vsel %vm1291_vm14, 0, %v1290_v46  ;;  %v448_v45 = vld [vmem:[%s2286_s2 + $0x20] sm:$0xff]  ;;  %v449_v46 = vld [vmem:[%s2286_s2 + $0x28] sm:$0xff] }
  0xbf   :  { %v223_v56 = vsub.s32 32, %v222_v55  ;;  %v227_v57 = vsub.s32 4294967266, %v222_v55  ;;  %v224_v58 = vshll.u32 %v215_v26, %v222_v55 }
  0xc0   :  { %v127_v50 = vand.u32 2147483647, %v126_v48  ;;  %v1621_v48 = vpack.c.bf16 %v449_v46, %v448_v45 }
  0xc1   :  { %v225_v47 = vshrl.u32 %v207_v42, %v223_v56  ;;  %v228_v49 = vadd.s32 127, %v227_v57  ;;  %v452_v42 = vld [vmem:[%s2286_s2 + $0x40] sm:$0xff]  ;;  %v453_v56 = vld [vmem:[%s2286_s2 + $0x48] sm:$0xff] }
  0xc2   :  { %v130_v37 = vmul.f32 %v129_v52, %v127_v50  ;;  %v450_v50 = vld [vmem:[%s2286_s2 + $0x30] sm:$0xff]  ;;  %v451_v52 = vld [vmem:[%s2286_s2 + $0x38] sm:$0xff]  ;;  %v1629_v57 = vpack.c.bf16 %v453_v56, %v452_v42  ;;  %v646_v42 = vld [vmem:[%s2286_s2 + $0xe0] sm:$0xff] }
  0xc3   :  { %v226_v44 = vor.u32 %v225_v47, %v224_v58  ;;  %v229_v54 = vshll.u32 %v228_v49, 23  ;;  %v1625_v55 = vpack.c.bf16 %v451_v52, %v450_v50  ;;  %v456_v47 = vld [vmem:[%s2286_s2 + $0x60] sm:$0xff]  ;;  %v457_v49 = vld [vmem:[%s2286_s2 + $0x68] sm:$0xff]  ;;  %v645_v50 = vld [vmem:[%s2286_s2 + $0xd8] sm:$0xff] }
  0xc4   :  { %v131_v51 = vxor.u32 2147483648, %v130_v37  ;;  %v647_v56 = vld [vmem:[%s2286_s2 + $0xe8] sm:$0xff] }
  0xc5   :  { %v230_v62 = vor.u32 4788187, %v229_v54  ;;  %v233_v1 = vcvt.s32.f32 %v226_v44  ;;  %v458_v44 = vld [vmem:[%s2286_s2 + $0x70] sm:$0xff]  ;;  %v459_v54 = vld [vmem:[%s2286_s2 + $0x78] sm:$0xff] }
  0xc6   :  { %v132_v59 = vsel %vm49_vm15, %v131_v51, %v130_v37  ;;  %v454_v37 = vld [vmem:[%s2286_s2 + $0x50] sm:$0xff]  ;;  %v1637_v51 = vpack.c.bf16 %v457_v49, %v456_v47 }
  0xc7   :  { %v135_v61 = vsel %vm48_vm0, %v1902_v22, %v132_v59  ;;  %v231_v0 = vand.u32 2147483647, %v230_v62  ;;  %v1633_v58 = vpack.c.bf16 %v455_v40, %v454_v37  ;;  %v1641_v59 = vpack.c.bf16 %v459_v54, %v458_v44  ;;  %v648_v37 = vld [vmem:[%s2286_s2 + $0xf0] sm:$0xff]  ;;  %v649_v40 = vld [vmem:[%s2286_s2 + $0xf8] sm:$0xff] }
  0xc8   :  { %1787 = vcosq.f32 %v135_v61 }
  0xc9   :  { %1789 = vsinq.f32 %v135_v61  ;;  %v234_v2 = vmul.f32 %v233_v1, %v231_v0  ;;  %v635_v61 = vld [vmem:[%s2286_s2 + $0x88] sm:$0xff]  ;;  %v347_v0 = vrot.slane %v1893_v16, %v2035_v63 }
  0xca   :  { %v1653_v62 = vpack.c.bf16 %v635_v61, %v634_v60 }
  0xcb   :  { %v235_v5 = vxor.u32 2147483648, %v234_v2 }
  0xcd   :  { %v236_v28 = vsel %vm153_vm1, %v235_v5, %v234_v2 }
  0xce   :  { %v239_v8 = vsel %vm152_vm2, %v1905_v27, %v236_v28  ;;  %v445_v27 = vld [vmem:[%s2286_s2 + $0x8] sm:$0xff] }
  0xcf   :  { %1791 = vcosq.f32 %v239_v8  ;;  %v1613_v39 = vpack.c.bf16 %v445_v27, %v444_v38  ;;  %v21_v28 = vld [vmem:[%s2287_s4 + $0x8] sm:$0xff]  ;;  %v641_v38 = vld [vmem:[%s2286_s2 + $0xb8] sm:$0xff] }
  0xd0   :  { %1793 = vsinq.f32 %v239_v8  ;;  %v544_v7 = vrot.slane %v21_v28, %v2035_v63 }
  0xd1   :  { %1614 = vmatprep.subr.bf16.mxu0 %v1613_v39 }
  0xd2   :  { %v1788_v9 = vpop.eup %1787  ;;  %1616 = vmatpush3.bf16.msra.mxu0 %v1613_v39 }
  0xd3   :  { %v1790_v12 = vpop.eup %1789  ;;  %v147_v53 = vxor.u32 2147483648, %v1788_v9 }
  0xd4   :  { %v144_v13 = vxor.u32 2147483648, %v1790_v12 }
  0xd5   :  { %v148_v18 = vsel %vm146_vm3, %v147_v53, %v1790_v12 }
  0xd6   :  { %v145_v20 = vsel %vm143_vm4, %v1788_v9, %v144_v13 }
  0xd7   :  { %v149_v31 = vsel %vm142_vm5, %v145_v20, %v148_v18 }
  0xd8   :  { %v150_v21 = vsel %vm139_vm7, nan, %v149_v31 }
  0xd9   :  { %1426 = vmatprep.mubr.msk.f32.mxu1 %vm348_vm6, %v150_v21  ;;  %v1792_v24 = vpop.eup %1791 }
  0xda   :  { %v1794_v25 = vpop.eup %1793  ;;  %v251_v26 = vxor.u32 2147483648, %v1792_v24 }
  0xdb   :  { %v248_v30 = vxor.u32 2147483648, %v1794_v25 }
  0xdc   :  { %v252_v22 = vsel %vm250_vm8, %v251_v26, %v1794_v25  ;;  %v637_v25 = vld [vmem:[%s2286_s2 + $0x98] sm:$0xff] }
  0xdd   :  { %v249_v29 = vsel %vm247_vm9, %v1792_v24, %v248_v30  ;;  %v636_v24 = vld [vmem:[%s2286_s2 + $0x90] sm:$0xff] }
  0xde   :  { %v253_v34 = vsel %vm246_vm10, %v249_v29, %v252_v22  ;;  %v1657_v22 = vpack.c.bf16 %v637_v25, %v636_v24  ;;  %v638_v29 = vld [vmem:[%s2286_s2 + $0xa0] sm:$0xff] }
  0xdf   :  { %v254_v36 = vsel %vm243_vm11, nan, %v253_v34  ;;  %v639_v34 = vld [vmem:[%s2286_s2 + $0xa8] sm:$0xff]  ;;  %v774_v24 = vld [vmem:[%s2286_s2 + $0x140] sm:$0xff] }
  0xe0   :  { %1427 = vmatmul.mubr.msk.f32.vlgmr.msra.gmra.mrb[0].mxu1 %vm348_vm6, %v254_v36 }
  0xe1   :  { %1648 = vmatpush3.bf16.msra.mxu1 %v1881_v11  ;;  %1472 = vmatprep.mubr.msk.f32.mxu1 %vm348_vm6, %v150_v21  ;;  %v446_v11 = vld [vmem:[%s2286_s2 + $0x10] sm:$0xff] }
  0xe2   :  { %1650 = vmatprep.subr.bf16.mxu1 %v1649_v35  ;;  %v1617_v41 = vpack.c.bf16 %v447_v43, %v446_v11  ;;  %v642_v43 = vld [vmem:[%s2286_s2 + $0xc0] sm:$0xff] }
  0xe4   :  { %1618 = vmatprep.subr.bf16.mxu0 %v1617_v41 }
  0xe5   :  { %1652 = vmatpush3.bf16.msra.mxu1 %v1649_v35  ;;  %1620 = vmatpush3.bf16.msra.mxu0 %v1617_v41  ;;  %v1661_v35 = vpack.c.bf16 %v639_v34, %v638_v29  ;;  %v643_v41 = vld [vmem:[%s2286_s2 + $0xc8] sm:$0xff] }
  0xe6   :  { %1622 = vmatprep.subr.bf16.mxu0 %v1621_v48  ;;  %v1669_v46 = vpack.c.bf16 %v643_v41, %v642_v43 }
  0xe8   :  { %1473 = vmatmul.mubr.msk.f32.vlgmr.msra.gmra.mrb[2].mxu1 %vm348_vm6, %v254_v36  ;;  %v640_v36 = vld [vmem:[%s2286_s2 + $0xb0] sm:$0xff] }
  0xe9   :  { %1624 = vmatpush3.bf16.msra.mxu0 %v1621_v48  ;;  %v1665_v11 = vpack.c.bf16 %v641_v38, %v640_v36  ;;  %v644_v48 = vld [vmem:[%s2286_s2 + $0xd0] sm:$0xff]  ;;  %v757_v38 = vsub.s32 5, %v1887_v14 }
  0xea   :  { %1626 = vmatprep.subr.bf16.mxu0 %v1625_v55 }
  0xed   :  { %1628 = vmatpush3.bf16.msra.mxu0 %v1625_v55  ;;  %v1673_v55 = vpack.c.bf16 %v645_v50, %v644_v48 }
  0xee   :  { %1630 = vmatprep.subr.bf16.mxu0 %v1629_v57 }
  0xf1   :  { %1632 = vmatpush3.bf16.msra.mxu0 %v1629_v57  ;;  %v1677_v57 = vpack.c.bf16 %v647_v56, %v646_v42 }
  0xf2   :  { %1634 = vmatprep.subr.bf16.mxu0 %v1633_v58 }
  0xf5   :  { %1636 = vmatpush3.bf16.msra.mxu0 %v1633_v58  ;;  %v1681_v58 = vpack.c.bf16 %v649_v40, %v648_v37  ;;  %v866_v37 = vld [vmem:[%s2286_s2 + $0x168] sm:$0xff]  ;;  %v867_v40 = vld [vmem:[%s2286_s2 + $0x170] sm:$0xff] }
  0xf6   :  { %1638 = vmatprep.subr.bf16.mxu0 %v1637_v51 }
  0xf9   :  { %1640 = vmatpush3.bf16.msra.mxu0 %v1637_v51  ;;  %v258_v51 = vsub.s32 4, %v1887_v14 }
  0xfa   :  { %1642 = vmatprep.subr.bf16.mxu0 %v1641_v59 }
  0xfb   :  { %v259_v44 = vrot.slane %v1893_v16, %v258_v51 }
  0xfd   :  { %1644 = vmatpush3.bf16.msra.mxu0 %v1641_v59 }
  0xfe   :  { %1654 = vmatprep.subr.bf16.mxu0 %v1653_v62 }
 0x1b3   :  { %v1428_v1 = vpop.f32.mrb[0].mxu1 }
 0x1b4   :  { %v427_v2 = vadd.f32 %v1428_v1, %v347_v0  ;;  %v421_v3 = vpop.f32.mrb[1].mxu1 }
 0x1b5   :  { %v422_v4 = vadd.f32 %v421_v3, %v347_v0 }
 0x1b6   :  { %v1297_v5 = vmul.f32 -1.442695, %v427_v2 }
 0x1b7   :  { %v1296_v6 = vmul.f32 -1.442695, %v422_v4 }
 0x1b8   :  { %1795 = vpow2.f32 %v1297_v5 }
 0x1b9   :  { %1797 = vpow2.f32 %v1296_v6 }
 0x1bb   :  { %v1474_v8 = vpop.f32.mrb[2].mxu1 }
 0x1bc   :  { %v611_v9 = vpop.f32.mrb[3].mxu1  ;;  %v617_v31 = vadd.f32 %v1474_v8, %v544_v7 }
 0x1bd   :  { %v612_v10 = vadd.f32 %v611_v9, %v544_v7 }
 0x1be   :  { %v1301_v30 = vmul.f32 -1.442695, %v617_v31 }
 0x1bf   :  { %v1300_v12 = vmul.f32 -1.442695, %v612_v10 }
 0x1c1   :  { %1799 = vpow2.f32 %v1300_v12  ;;  %v768_v12 = vld [vmem:[%s2286_s2 + $0x110] sm:$0xff] }
 0x1c2   :  { %v1796_v53 = vpop.eup %1795 }
 0x1c3   :  { %v1798_v13 = vpop.eup %1797  ;;  %v437_v18 = vadd.f32 1.0, %v1796_v53 }
 0x1c4   :  { %v436_v19 = vadd.f32 1.0, %v1798_v13  ;;  %v769_v13 = vld [vmem:[%s2286_s2 + $0x118] sm:$0xff] }
 0x1c5   :  { %1801 = vrcp.f32 %v437_v18  ;;  %v770_v18 = vld [vmem:[%s2286_s2 + $0x120] sm:$0xff] }
 0x1c6   :  { %1803 = vrcp.f32 %v436_v19  ;;  %v1689_v19 = vpack.c.bf16 %v770_v18, %v769_v13 }
 0x1cb   :  { %v1800_v20 = vpop.eup %1799 }
 0x1cc   :  { %v626_v21 = vadd.f32 1.0, %v1800_v20  ;;  %v771_v20 = vld [vmem:[%s2286_s2 + $0x128] sm:$0xff] }
 0x1ce   :  { %1805 = vrcp.f32 %v626_v21 }
 0x1cf   :  { %v1802_v23 = vpop.eup %1801  ;;  %1807 = vpow2.f32 %v1301_v30  ;;  %v863_v30 = vld [vmem:[%s2286_s2 + $0x150] sm:$0xff] }
 0x1d0   :  { %v1804_v26 = vpop.eup %1803  ;;  %v443_v33 = vmul.f32 %v1802_v23, %v427_v2  ;;  %v773_v23 = vld [vmem:[%s2286_s2 + $0x138] sm:$0xff] }
 0x1d1   :  { %v442_v32 = vmul.f32 %v1804_v26, %v422_v4  ;;  %v1697_v25 = vpack.c.bf16 %v774_v24, %v773_v23  ;;  %v862_v26 = vld [vmem:[%s2286_s2 + $0x148] sm:$0xff] }
 0x1d2   :  { %v995_v24 = vld [vmem:[%s2286_s2 + $0x188] sm:$0xff] }
 0x1d3   :  { %1461 = vmatprep.mubr.f32.mxu0 %v442_v32  ;;  %v1701_v32 = vpack.c.bf16 %v863_v30, %v862_v26  ;;  %v997_v30 = vld [vmem:[%s2286_s2 + $0x198] sm:$0xff] }
 0x1d4   :  { %1462 = vmatmul.mubr.f32.vlgmr.msra.gmra.mrb[0].mxu0 %v443_v33 }
 0x1d5   :  { %1656 = vmatpush3.bf16.msra.mxu0 %v1653_v62 }
 0x1d6   :  { %1658 = vmatprep.subr.bf16.mxu0 %v1657_v22 }
 0x1d8   :  { %v1806_v27 = vpop.eup %1805 }
 0x1d9   :  { %v632_v39 = vmul.f32 %v1806_v27, %v612_v10  ;;  %1660 = vmatpush3.bf16.msra.mxu0 %v1657_v22  ;;  %v1808_v45 = vpop.eup %1807  ;;  %v767_v10 = vld [vmem:[%s2286_s2 + $0x108] sm:$0xff]  ;;  %v763_v27 = vsub.s32 6, %v1887_v14 }
 0x1da   :  { %1662 = vmatprep.subr.bf16.mxu0 %v1661_v35  ;;  %v627_v52 = vadd.f32 1.0, %v1808_v45  ;;  %v1685_v53 = vpack.c.bf16 %v768_v12, %v767_v10 }
 0x1db   :  { %1507 = vmatprep.mubr.f32.mxu0 %v632_v39  ;;  %v758_v39 = vrot.slane %v1893_v16, %v757_v38  ;;  %v764_v41 = vrot.slane %v1893_v16, %v763_v27  ;;  %v1090_v27 = vld [vmem:[%s2286_s2 + $0x1c8] sm:$0xff] }
 0x1dc   :  { %1809 = vrcp.f32 %v627_v52  ;;  %1686 = vmatprep.subr.bf16.mxu1 %v1685_v53  ;;  %v864_v52 = vld [vmem:[%s2286_s2 + $0x158] sm:$0xff] }
 0x1dd   :  { %1664 = vmatpush3.bf16.msra.mxu0 %v1661_v35  ;;  %1688 = vmatpush3.bf16.msra.mxu1 %v1685_v53 }
 0x1de   :  { %1666 = vmatprep.subr.bf16.mxu0 %v1665_v11  ;;  %1690 = vmatprep.subr.bf16.mxu1 %v1689_v19 }
 0x1e1   :  { %1668 = vmatpush3.bf16.msra.mxu0 %v1665_v11  ;;  %1692 = vmatpush3.bf16.msra.mxu1 %v1689_v19 }
 0x1e2   :  { %1670 = vmatprep.subr.bf16.mxu0 %v1669_v46 }
 0x1e5   :  { %1672 = vmatpush3.bf16.msra.mxu0 %v1669_v46 }
 0x1e6   :  { %1674 = vmatprep.subr.bf16.mxu0 %v1673_v55  ;;  %v1810_v47 = vpop.eup %1809 }
 0x1e7   :  { %v633_v49 = vmul.f32 %v1810_v47, %v617_v31  ;;  %v772_v31 = vld [vmem:[%s2286_s2 + $0x130] sm:$0xff]  ;;  %v868_v47 = vld [vmem:[%s2286_s2 + $0x178] sm:$0xff] }
 0x1e8   :  { %v1693_v21 = vpack.c.bf16 %v772_v31, %v771_v20 }
 0x1e9   :  { %1676 = vmatpush3.bf16.msra.mxu0 %v1673_v55  ;;  %v865_v55 = vld [vmem:[%s2286_s2 + $0x160] sm:$0xff] }
 0x1ea   :  { %1678 = vmatprep.subr.bf16.mxu0 %v1677_v57  ;;  %1694 = vmatprep.subr.bf16.mxu1 %v1693_v21 }
 0x1eb   :  { %1696 = vmatpush3.bf16.msra.mxu1 %v1693_v21 }
 0x1ec   :  { %1698 = vmatprep.subr.bf16.mxu1 %v1697_v25 }
 0x1ed   :  { %1680 = vmatpush3.bf16.msra.mxu0 %v1677_v57  ;;  %v1705_v57 = vpack.c.bf16 %v865_v55, %v864_v52  ;;  %v985_v52 = vsub.s32 1, %v1887_v14 }
 0x1ee   :  { %1682 = vmatprep.subr.bf16.mxu0 %v1681_v58 }
 0x1ef   :  { %1700 = vmatpush3.bf16.msra.mxu1 %v1697_v25  ;;  %v996_v25 = vld [vmem:[%s2286_s2 + $0x190] sm:$0xff] }
 0x1f0   :  { %1702 = vmatprep.subr.bf16.mxu1 %v1701_v32  ;;  %v1717_v26 = vpack.c.bf16 %v996_v25, %v995_v24  ;;  %v1192_v24 = vld [vmem:[%s2288_s3 + $0x38] sm:$0xff] }
 0x1f1   :  { %1684 = vmatpush3.bf16.msra.mxu0 %v1681_v58  ;;  %v1709_v58 = vpack.c.bf16 %v867_v40, %v866_v37 }
 0x1f4   :  { %1508 = vmatmul.mubr.f32.vlgmr.msra.gmra.mrb[0].mxu0 %v633_v49  ;;  %v869_v49 = vld [vmem:[%s2286_s2 + $0x180] sm:$0xff] }
 0x2c7   :  { %v1509_v54 = vpop.f32.mrb[0].mxu0 }
 0x2c8   :  { %v716_v59 = vpop.f32.mrb[1].mxu0  ;;  %v2091_v61 = vadd.f32 %v1509_v54, %v259_v44  ;;  %v777_v54 = vsub.s32 7, %v1887_v14 }
 0x2c9   :  { %v2089_v60 = vadd.f32 %v716_v59, %v259_v44  ;;  %v1713_v44 = vpack.c.bf16 %v869_v49, %v868_v47  ;;  %v1092_v49 = vld [vmem:[%s2286_s2 + $0x1d8] sm:$0xff] }
 0x2ca   :  { %v731_v0 = vsel %vm727_vm12, %v2091_v61, 0.0  ;;  %v778_v59 = vrot.slane %v1893_v16, %v777_v54 }
 0x2cb   :  { %v728_v62 = vsel %vm727_vm12, %v2089_v60, 0.0 }
 0x2cc   :  { %729 = vadd.xlane.f32.xlu1 %v728_v62 }
 0x2d0   :  { %732 = vadd.xlane.f32.xlu1 %v731_v0 }
 0x359   :  { %v730_v1 = vpop.xlane.xlu1 %729 }
 0x35a   :  { %v735_v2 = vmul.f32 0.015625, %v730_v1 }
 0x35c   :  { %v737_v3 = vsub.f32 %v2089_v60, %v735_v2 }
 0x35d   :  { %v733_v4 = vpop.xlane.xlu1 %732 }
 0x35e   :  { %v736_v5 = vmul.f32 0.015625, %v733_v4  ;;  %v739_v28 = vmul.f32 %v737_v3, %v737_v3 }
 0x360   :  { %v738_v6 = vsub.f32 %v2091_v61, %v736_v5  ;;  %v741_v7 = vsel %vm727_vm12, %v739_v28, 0.0  ;;  %v2162_v5 = vld [vmem:[%s2287_s4 + $0x10] sm:$0xff] }
 0x361   :  { %742 = vadd.xlane.f32.xlu0 %v741_v7  ;;  %v873_v28 = vrot.slane %v2162_v5, %v2035_v63  ;;  %v986_v55 = vrot.slane %v2162_v5, %v985_v52 }
 0x362   :  { %v740_v8 = vmul.f32 %v738_v6, %v738_v6 }
 0x364   :  { %v744_v9 = vsel %vm727_vm12, %v740_v8, 0.0 }
 0x365   :  { %745 = vadd.xlane.f32.xlu1 %v744_v9 }
 0x3ee   :  { %v743_v33 = vpop.xlane.xlu0 %742 }
 0x3ef   :  { %v747_v22 = vmul.f32 0.015625, %v743_v33 }
 0x3f1   :  { %v749_v29 = vadd.f32 1e-05, %v747_v22  ;;  %v999_v22 = vld [vmem:[%s2286_s2 + $0x1a8] sm:$0xff] }
 0x3f2   :  { %v746_v34 = vpop.xlane.xlu1 %745 }
 0x3f3   :  { %1811 = vrsqrt.f32 %v749_v29  ;;  %v748_v35 = vmul.f32 0.015625, %v746_v34  ;;  %v1000_v29 = vld [vmem:[%s2286_s2 + $0x1b0] sm:$0xff] }
 0x3f4   :  { %v1725_v34 = vpack.c.bf16 %v1000_v29, %v999_v22 }
 0x3f5   :  { %v750_v36 = vadd.f32 1e-05, %v748_v35  ;;  %v1001_v35 = vld [vmem:[%s2286_s2 + $0x1b8] sm:$0xff] }
 0x3f7   :  { %1813 = vrsqrt.f32 %v750_v36  ;;  %v1002_v36 = vld [vmem:[%s2286_s2 + $0x1c0] sm:$0xff] }
 0x3f8   :  { %v1729_v38 = vpack.c.bf16 %v1002_v36, %v1001_v35 }
 0x3fd   :  { %v1812_v11 = vpop.eup %1811 }
 0x3fe   :  { %v753_v43 = vmul.f32 %v1812_v11, %v737_v3 }
 0x400   :  { %v759_v45 = vmul.f32 %v758_v39, %v753_v43 }
 0x401   :  { %v1814_v46 = vpop.eup %1813 }
 0x402   :  { %v754_v48 = vmul.f32 %v1814_v46, %v738_v6  ;;  %v765_v50 = vadd.f32 %v764_v41, %v759_v45 }
 0x404   :  { %v760_v42 = vmul.f32 %v758_v39, %v754_v48  ;;  %1526 = vmatprep.mubr.msk.f32.mxu1 %vm727_vm12, %v765_v50  ;;  %v1091_v39 = vld [vmem:[%s2286_s2 + $0x1d0] sm:$0xff] }
 0x405   :  { %v1733_v11 = vpack.c.bf16 %v1091_v39, %v1090_v27 }
 0x406   :  { %v766_v56 = vadd.f32 %v764_v41, %v760_v42 }
 0x408   :  { %1527 = vmatmul.mubr.msk.f32.vlgmr.msra.gmra.mrb[4].mxu1 %vm727_vm12, %v766_v56  ;;  %v992_v56 = vrot.slane %v2162_v5, %v37_v15  ;;  %v1094_v15 = vld [vmem:[%s2286_s2 + $0x1e8] sm:$0xff] }
 0x409   :  { %1704 = vmatpush3.bf16.msra.mxu1 %v1701_v32  ;;  %v998_v32 = vld [vmem:[%s2286_s2 + $0x1a0] sm:$0xff] }
 0x40a   :  { %1706 = vmatprep.subr.bf16.mxu1 %v1705_v57  ;;  %v1721_v33 = vpack.c.bf16 %v998_v32, %v997_v30 }
 0x40d   :  { %1708 = vmatpush3.bf16.msra.mxu1 %v1705_v57 }
 0x40e   :  { %1710 = vmatprep.subr.bf16.mxu1 %v1709_v58 }
 0x411   :  { %1712 = vmatpush3.bf16.msra.mxu1 %v1709_v58 }
 0x412   :  { %1714 = vmatprep.subr.bf16.mxu1 %v1713_v44 }
 0x415   :  { %1716 = vmatpush3.bf16.msra.mxu1 %v1713_v44  ;;  %v1093_v44 = vld [vmem:[%s2286_s2 + $0x1e0] sm:$0xff] }
 0x416   :  { %1718 = vmatprep.subr.bf16.mxu1 %v1717_v26 }
 0x4db   :  { %v1528_v62 = vpop.f32.mrb[4].mxu1 }
 0x4dc   :  { %v857_v0 = vadd.f32 %v1528_v62, %v778_v59  ;;  %v851_v1 = vpop.f32.mrb[5].mxu1  ;;  %v1737_v62 = vpack.c.bf16 %v1093_v44, %v1092_v49 }
 0x4dd   :  { %v852_v2 = vadd.f32 %v851_v1, %v778_v59 }
 0x4de   :  { %v861_v4 = vmax.f32 %v857_v0, 0.0  ;;  %v1095_v0 = vld [vmem:[%s2286_s2 + $0x1f0] sm:$0xff] }
 0x4df   :  { %v860_v3 = vmax.f32 %v852_v2, 0.0  ;;  %v1741_v1 = vpack.c.bf16 %v1095_v0, %v1094_v15  ;;  %v1096_v2 = vld [vmem:[%s2286_s2 + $0x1f8] sm:$0xff] }
 0x4e1   :  { %1545 = vmatprep.mubr.msk.f32.mxu1 %vm727_vm12, %v860_v3  ;;  %v1097_v3 = vld [vmem:[%s2286_s2 + $0x200] sm:$0xff] }
 0x4e2   :  { %1546 = vmatmul.mubr.msk.f32.vlgmr.msra.gmra.mrb[6].mxu1 %vm727_vm12, %v861_v4  ;;  %v1745_v4 = vpack.c.bf16 %v1097_v3, %v1096_v2 }
 0x4e3   :  { %1720 = vmatpush3.bf16.msra.mxu1 %v1717_v26 }
 0x4e4   :  { %1722 = vmatprep.subr.bf16.mxu1 %v1721_v33 }
 0x4e7   :  { %1724 = vmatpush3.bf16.msra.mxu1 %v1721_v33 }
 0x4e8   :  { %1726 = vmatprep.subr.bf16.mxu1 %v1725_v34 }
 0x4eb   :  { %1728 = vmatpush3.bf16.msra.mxu1 %v1725_v34  ;;  %v1819_v34 = vld [vmem:[%s2287_s4] sm:$0xff] }
 0x4ec   :  { %1730 = vmatprep.subr.bf16.mxu1 %v1729_v38  ;;  %v1196_v35 = vrot.slane %v1819_v34, %v985_v52 }
 0x4ef   :  { %1732 = vmatpush3.bf16.msra.mxu1 %v1729_v38 }
 0x4f0   :  { %1734 = vmatprep.subr.bf16.mxu1 %v1733_v11 }
 0x5b5   :  { %v1547_v6 = vpop.f32.mrb[6].mxu1 }
 0x5b6   :  { %v946_v16 = vpop.f32.mrb[7].mxu1  ;;  %v952_v7 = vadd.f32 %v1547_v6, %v873_v28  ;;  %v1186_v6 = vld [vmem:[%s2288_s3 + $0x8] sm:$0xff] }
 0x5b7   :  { %v947_v8 = vadd.f32 %v946_v16, %v873_v28  ;;  %v1185_v28 = vld [vmem:[%s2288_s3] sm:$0xff]  ;;  %v1187_v16 = vld [vmem:[%s2288_s3 + $0x10] sm:$0xff] }
 0x5b8   :  { %v2170_v10 = vadd.f32 %v2091_v61, %v952_v7  ;;  %v1749_v7 = vpack.c.bf16 %v1186_v6, %v1185_v28 }
 0x5b9   :  { %v2167_v9 = vadd.f32 %v2089_v60, %v947_v8  ;;  %v1188_v8 = vld [vmem:[%s2288_s3 + $0x18] sm:$0xff] }
 0x5ba   :  { %v960_v53 = vsel %vm727_vm12, %v2170_v10, 0.0  ;;  %1750 = vmatprep.subr.bf16.mxu0 %v1749_v7 }
 0x5bb   :  { %v957_v12 = vsel %vm727_vm12, %v2167_v9, 0.0  ;;  %1752 = vmatpush3.bf16.msra.mxu0 %v1749_v7 }
 0x5bc   :  { %958 = vadd.xlane.f32.xlu1 %v957_v12  ;;  %v1753_v12 = vpack.c.bf16 %v1188_v8, %v1187_v16 }
 0x5be   :  { %1754 = vmatprep.subr.bf16.mxu0 %v1753_v12 }
 0x5bf   :  { %1756 = vmatpush3.bf16.msra.mxu0 %v1753_v12 }
 0x5c0   :  { %961 = vadd.xlane.f32.xlu1 %v960_v53  ;;  %v1189_v53 = vld [vmem:[%s2288_s3 + $0x20] sm:$0xff] }
 0x649   :  { %v959_v13 = vpop.xlane.xlu1 %958 }
 0x64a   :  { %v963_v63 = vmul.f32 0.015625, %v959_v13  ;;  %v1190_v13 = vld [vmem:[%s2288_s3 + $0x28] sm:$0xff] }
 0x64c   :  { %v965_v18 = vsub.f32 %v2167_v9, %v963_v63  ;;  %v1757_v63 = vpack.c.bf16 %v1190_v13, %v1189_v53 }
 0x64d   :  { %v962_v19 = vpop.xlane.xlu1 %961 }
 0x64e   :  { %v964_v20 = vmul.f32 0.015625, %v962_v19  ;;  %v967_v31 = vmul.f32 %v965_v18, %v965_v18  ;;  %1758 = vmatprep.subr.bf16.mxu0 %v1757_v63 }
 0x64f   :  { %1760 = vmatpush3.bf16.msra.mxu0 %v1757_v63 }
 0x650   :  { %v966_v60 = vsub.f32 %v2170_v10, %v964_v20  ;;  %v969_v61 = vsel %vm727_vm12, %v967_v31, 0.0 }
 0x651   :  { %970 = vadd.xlane.f32.xlu1 %v969_v61 }
 0x652   :  { %v968_v21 = vmul.f32 %v966_v60, %v966_v60 }
 0x654   :  { %v972_v23 = vsel %vm727_vm12, %v968_v21, 0.0 }
 0x655   :  { %973 = vadd.xlane.f32.xlu1 %v972_v23  ;;  %v1191_v23 = vld [vmem:[%s2288_s3 + $0x30] sm:$0xff] }
 0x656   :  { %v1761_v25 = vpack.c.bf16 %v1192_v24, %v1191_v23 }
 0x658   :  { %1762 = vmatprep.subr.bf16.mxu0 %v1761_v25 }
 0x659   :  { %1764 = vmatpush3.bf16.msra.mxu0 %v1761_v25 }
 0x6de   :  { %v971_v43 = vpop.xlane.xlu1 %970 }
 0x6df   :  { %v975_v41 = vmul.f32 0.015625, %v971_v43 }
 0x6e1   :  { %v977_v45 = vadd.f32 1e-05, %v975_v41 }
 0x6e2   :  { %v974_v46 = vpop.xlane.xlu1 %973 }
 0x6e3   :  { %1815 = vrsqrt.f32 %v977_v45  ;;  %v976_v48 = vmul.f32 0.015625, %v974_v46 }
 0x6e5   :  { %v978_v50 = vadd.f32 1e-05, %v976_v48 }
 0x6e7   :  { %1817 = vrsqrt.f32 %v978_v50 }
 0x6ed   :  { %v1816_v42 = vpop.eup %1815 }
 0x6ee   :  { %v981_v57 = vmul.f32 %v1816_v42, %v965_v18  ;;  %v1006_v18 = vrot.slane %v2162_v5, %v43_v17  ;;  %v1101_v17 = vrot.slane %v2162_v5, %v258_v51 }
 0x6f0   :  { %v987_v37 = vmul.f32 %v986_v55, %v981_v57 }
 0x6f1   :  { %v1818_v40 = vpop.eup %1817 }
 0x6f2   :  { %v982_v58 = vmul.f32 %v1818_v40, %v966_v60  ;;  %v993_v47 = vadd.f32 %v992_v56, %v987_v37 }
 0x6f4   :  { %v988_v54 = vmul.f32 %v986_v55, %v982_v58  ;;  %1564 = vmatprep.mubr.msk.f32.mxu1 %vm727_vm12, %v993_v47 }
 0x6f6   :  { %v994_v59 = vadd.f32 %v992_v56, %v988_v54 }
 0x6f8   :  { %1565 = vmatmul.mubr.msk.f32.vlgmr.msra.gmra.mrb[8].mxu1 %vm727_vm12, %v994_v59 }
 0x6f9   :  { %1736 = vmatpush3.bf16.msra.mxu1 %v1733_v11 }
 0x6fa   :  { %1738 = vmatprep.subr.bf16.mxu1 %v1737_v62 }
 0x6fd   :  { %1740 = vmatpush3.bf16.msra.mxu1 %v1737_v62 }
 0x6fe   :  { %1742 = vmatprep.subr.bf16.mxu1 %v1741_v1 }
 0x701   :  { %1744 = vmatpush3.bf16.msra.mxu1 %v1741_v1 }
 0x702   :  { %1746 = vmatprep.subr.bf16.mxu1 %v1745_v4 }
 0x705   :  { %1748 = vmatpush3.bf16.msra.mxu1 %v1745_v4 }
 0x7cb   :  { %v1566_v19 = vpop.f32.mrb[8].mxu1 }
 0x7cc   :  { %v1085_v20 = vadd.f32 %v1566_v19, %v1006_v18  ;;  %v1079_v31 = vpop.f32.mrb[9].mxu1 }
 0x7cd   :  { %v1080_v60 = vadd.f32 %v1079_v31, %v1006_v18 }
 0x7ce   :  { %v1089_v21 = vmax.f32 %v1085_v20, 0.0 }
 0x7cf   :  { %v1088_v61 = vmax.f32 %v1080_v60, 0.0 }
 0x7d1   :  { %1583 = vmatprep.mubr.msk.f32.mxu1 %vm727_vm12, %v1088_v61 }
 0x7d2   :  { %1584 = vmatmul.mubr.msk.f32.vlgmr.msra.gmra.mrb[10].mxu1 %vm727_vm12, %v1089_v21 }
 0x8a5   :  { %v1585_v26 = vpop.f32.mrb[10].mxu1 }
 0x8a6   :  { %v1180_v30 = vadd.f32 %v1585_v26, %v1101_v17  ;;  %v1174_v32 = vpop.f32.mrb[11].mxu1 }
 0x8a7   :  { %v1175_v33 = vadd.f32 %v1174_v32, %v1101_v17 }
 0x8a8   :  { %v1184_v29 = vadd.f32 %v1180_v30, %v2170_v10 }
 0x8a9   :  { %v1183_v22 = vadd.f32 %v1175_v33, %v2167_v9 }
 0x8ab   :  { %1602 = vmatprep.mubr.msk.f32.mxu0 %vm727_vm12, %v1183_v22 }
 0x8ac   :  { %1603 = vmatmul.mubr.msk.f32.vlgmr.msra.gmra.mrb[2].mxu0 %vm727_vm12, %v1184_v29 }
 0x97f   :  { %v1604_v51 = vpop.f32.mrb[2].mxu0 }
 0x980   :  { %v1275_v5 = vadd.f32 %v1604_v51, %v1196_v35  ;;  %v1269_v36 = vpop.f32.mrb[3].mxu0 }
 0x981   :  { %v1270_v38 = vadd.f32 %v1269_v36, %v1196_v35 }
 0x982   :  { %1279 = vst [vmem:[%s2289_s5 + $0x8] sm:$0xff] %v1275_v5 }
 0x983   :  { %1278 = vst [vmem:[%s2289_s5] sm:$0xff] %v1270_v38 }

</bundles_post_ra>
